<compile_context>
chip_gen: v6e
topology: v6e:2x2x1
jax: 0.10.0
libtpu: 0.0.40
codegen_flags: <defaults>
</compile_context>

<pallas_src>
import functools

import jax
import jax.numpy as jnp
from jax.experimental import pallas as pl
from jax.experimental.pallas import tpu as pltpu


_MIB = 1024 * 1024
_VMEM_SAFE_BUDGET = 48 * _MIB      # headroom under v7x's 64 MiB physical VMEM
_STEP_OVERHEAD_BYTES = 450_000     # ~0.35 us per grid step at ~1.3 TB/s HBM


def _round_up(x, m):
    return (x + m - 1) // m * m


# --------------------------------------------------------------------------
# Stage 1: Linear  (B*N_p, Fin_p) @ (Fin_p, Fout_p) -> bf16 features
#   * input read as f32 and cast to bf16 in-kernel (no separate cast pass)
# --------------------------------------------------------------------------
def _linear_kernel(x_ref, w_ref, o_ref):
    # x_ref: (TM1, Fin_p) f32   w_ref: (Fin_p, Fout_p) bf16   o_ref: bf16
    x = x_ref[...].astype(w_ref.dtype)
    o_ref[...] = jnp.dot(
        x, w_ref[...], preferred_element_type=jnp.float32
    ).astype(o_ref.dtype)


def _linear(x_flat, w_t, out_dtype):
    M, Fin_p = x_flat.shape
    Fout_p = w_t.shape[1]

    # Largest power-of-two M tile (<=1024) that divides M ...
    tm = 128
    while tm * 2 <= min(M, 1024) and M % (tm * 2) == 0:
        tm *= 2
    # ... and fits the VMEM budget (double-buffered input/out + resident W).
    def _need(t):
        return 2 * t * Fin_p * 4 + 2 * Fin_p * Fout_p * 2 + 2 * t * Fout_p * 2
    while _need(tm) > _VMEM_SAFE_BUDGET and tm > 128:
        tm //= 2
    vmem_limit = min(max(32 * _MIB, _need(tm) + 4 * _MIB), 56 * _MIB)

    return pl.pallas_call(
        _linear_kernel,
        out_shape=jax.ShapeDtypeStruct((M, Fout_p), out_dtype),
        grid_spec=pl.GridSpec(
            grid=(M // tm,),
            in_specs=[
                pl.BlockSpec((tm, Fin_p), lambda i: (i, 0)),
                pl.BlockSpec((Fin_p, Fout_p), lambda i: (0, 0)),
            ],
            out_specs=pl.BlockSpec((tm, Fout_p), lambda i: (i, 0)),
        ),
        compiler_params=pltpu.CompilerParams(
            dimension_semantics=("parallel",),
            vmem_limit_bytes=vmem_limit,
        ),
    )(x_flat, w_t)


# --------------------------------------------------------------------------
# Stage 2: out = PReLU(bmm(adj, fts) + bias)
#   * K-tiled adj, grid (B, N_p/TM, N_p/TK), K last + "arbitrary"
#   * f32 output tile is the accumulator (block index constant across k)
#   * fts either VMEM-resident per batch or K-tiled (chosen at setup)
# --------------------------------------------------------------------------
def _adj_bmm_kernel(alpha_ref, adj_ref, fts_ref, b_ref, o_ref):
    # alpha_ref: (1,) f32 in SMEM (shared PReLU slope)
    # adj_ref:   (1, TM, TK)      bf16
    # fts_ref:   (1, TK, Fout_p)  bf16 (K-tiled)  OR  (1, N_p, Fout_p) resident
    # b_ref:     (1, Fout_p)      f32
    # o_ref:     (1, TM, Fout_p)  f32, VMEM-resident across k -> accumulator
    k = pl.program_id(2)
    tk = adj_ref.shape[2]

    if fts_ref.shape[1] == tk:              # K-tiled fts spec
        fts_blk = fts_ref[0]
    else:                                   # per-batch resident fts spec
        start = pl.multiple_of(k * tk, tk)
        fts_blk = fts_ref[0, pl.ds(start, tk), :]

    part = jnp.dot(adj_ref[0], fts_blk, preferred_element_type=jnp.float32)

    @pl.when(k == 0)
    def _():
        o_ref[0] = part

    @pl.when(k > 0)
    def _():
        o_ref[0] = o_ref[0] + part

    @pl.when(k == pl.num_programs(2) - 1)
    def _():
        out = o_ref[0] + b_ref[...]          # bias add in f32
        alpha = alpha_ref[0]                 # shared PReLU slope
        o_ref[0] = jnp.where(out > 0, out, alpha * out)


def _pick_stage2_tiles(N, Fout_p):
    """Choose (TM, TK, N_p) minimizing adj traffic + per-step overhead.
    TM/TK are power-of-two multiples of 128, so max(TM, TK) is their lcm and
    N is padded up to it (keeps every tile lane/sublane dense)."""
    candidates = (128, 256, 512, 1024)
    best = None
    for tm in candidates:
        if tm > 512:
            continue                        # keep >=2 row tiles / small out tile
        for tk in candidates:
            n_p = _round_up(max(N, 128), max(tm, tk))
            fixed = 2 * tm * tk * 2 + 2 * tm * Fout_p * 4    # adj + out tiles
            if fixed > _VMEM_SAFE_BUDGET // 2:
                continue
            steps = (n_p // tm) * (n_p // tk)
            cost = 2 * n_p * n_p + _STEP_OVERHEAD_BYTES * steps
            if best is None or cost < best[0]:
                best = (cost, tm, tk, n_p)
    assert best is not None, "no valid stage-2 tile configuration"
    _, tm, tk, n_p = best
    return tm, tk, n_p


def make_gcn_dgi(adj, weight, bias, prelu_alpha, *, compute_dtype=jnp.bfloat16):
    """One-time setup: pad + bf16-cast the fixed adjacency / weight, choose
    tiles and build the pallas_call; returns a jitted forward(seq) callable."""
    B, N, N2 = adj.shape
    assert N == N2, "adjacency must be square per batch"
    Fout, Fin = weight.shape

    Fin_p = _round_up(Fin, 128)
    Fout_p = _round_up(Fout, 128)
    TM, TK, N_p = _pick_stage2_tiles(N, Fout_p)

    # ---- one-time padded / bf16 operands (amortized across calls) ---------
    adj_p = jnp.pad(adj, ((0, 0), (0, N_p - N), (0, N_p - N))).astype(compute_dtype)
    w_t = jnp.pad(weight.T, ((0, Fin_p - Fin), (0, Fout_p - Fout))).astype(compute_dtype)
    bias_p = jnp.pad(jnp.asarray(bias, jnp.float32),
                     (0, Fout_p - Fout)).reshape(1, Fout_p)
    alpha = jnp.asarray(prelu_alpha, jnp.float32).reshape(1)

    # ---- fts placement: resident per batch if it fits the VMEM budget -----
    fixed_bytes = 2 * TM * TK * 2 + 2 * TM * Fout_p * 4 + 2 * Fout_p * 4
    fts_resident_bytes = 2 * N_p * Fout_p * 2
    fts_tiled_bytes = 2 * TK * Fout_p * 2
    use_resident_fts = fixed_bytes + fts_resident_bytes <= _VMEM_SAFE_BUDGET
    fts_bytes = fts_resident_bytes if use_resident_fts else fts_tiled_bytes
    vmem_limit = min(max(32 * _MIB, fixed_bytes + fts_bytes + 4 * _MIB), 56 * _MIB)

    if use_resident_fts:
        fts_spec = pl.BlockSpec((1, N_p, Fout_p), lambda b, i, k: (b, 0, 0))
    else:
        fts_spec = pl.BlockSpec((1, TK, Fout_p), lambda b, i, k: (b, k, 0))

    stage2 = pl.pallas_call(
        _adj_bmm_kernel,
        out_shape=jax.ShapeDtypeStruct((B, N_p, Fout_p), jnp.float32),
        grid_spec=pltpu.PrefetchScalarGridSpec(
            num_scalar_prefetch=0,
            grid=(B, N_p // TM, N_p // TK),
            in_specs=[
                pl.BlockSpec(memory_space=pltpu.SMEM),                    # alpha
                pl.BlockSpec((1, TM, TK), lambda b, i, k: (b, i, k)),     # adj
                fts_spec,                                                 # fts
                pl.BlockSpec((1, Fout_p), lambda b, i, k: (0, 0)),        # bias
            ],
            out_specs=pl.BlockSpec((1, TM, Fout_p), lambda b, i, k: (b, i, 0)),
        ),
        compiler_params=pltpu.CompilerParams(
            dimension_semantics=("parallel", "parallel", "arbitrary"),
            vmem_limit_bytes=vmem_limit,
        ),
    )

    def _forward(adj_pp, w_tt, bias_pp, alpha_p, seq):
        # Per-call work: pad the (small) feature tensor only; the bf16 cast of
        # seq happens inside the stage-1 kernel.
        seq_p = jnp.pad(seq.astype(jnp.float32),
                        ((0, 0), (0, N_p - N), (0, Fin_p - Fin)))
        fts = _linear(seq_p.reshape(B * N_p, Fin_p), w_tt, compute_dtype)
        fts = fts.reshape(B, N_p, Fout_p)
        out_p = stage2(alpha_p, adj_pp, fts, bias_pp)
        return out_p[:, :N, :Fout]

    return jax.jit(functools.partial(_forward, adj_p, w_t, bias_p, alpha))


def _xavier_uniform(key, shape):
    # torch.nn.init.xavier_uniform_ on a (fan_out, fan_in) Linear weight
    fan_out, fan_in = shape
    limit = (6.0 / (fan_in + fan_out)) ** 0.5
    return jax.random.uniform(key, shape, jnp.float32, -limit, limit)


if __name__ == "__main__":
    B, N, Fin, Fout = 2, 16, 32, 32

    key = jax.random.PRNGKey(0)
    k_seq, k_adj, k_w = jax.random.split(key, 3)

    seq = jax.random.normal(k_seq, (B, N, Fin), jnp.float32)
    # row-normalized dense adjacency (any dense matrix works for bmm)
    adj_raw = jax.random.uniform(k_adj, (B, N, N), jnp.float32)
    adj = adj_raw / jnp.sum(adj_raw, axis=-1, keepdims=True)

    weight = _xavier_uniform(k_w, (Fout, Fin))     # nn.Linear weight
    bias = jnp.zeros((Fout,), jnp.float32)         # bias.data.fill_(0.0)
    prelu_alpha = 0.25                             # nn.PReLU() default

    fwd = make_gcn_dgi(adj, weight, bias, prelu_alpha)   # one-time setup
    out = jax.block_until_ready(fwd(seq))

    # Reference in plain f32 JAX (same semantics as the torch forward).
    fts_ref = seq @ weight.T
    out_ref = jnp.einsum("bij,bjf->bif", adj, fts_ref) + bias
    out_ref = jnp.where(out_ref > 0, out_ref, prelu_alpha * out_ref)

    assert out.shape == out_ref.shape
    # bf16 operands with f32 accumulation -> loosened tolerance vs f32 ref.
    assert jnp.allclose(out, out_ref, atol=5e-2, rtol=5e-2), float(
        jnp.max(jnp.abs(out - out_ref))
    )

    print("KERNEL_OK")
</pallas_src>

<mosaic_0001>
module attributes {stable_mosaic.version = 11 : i64} {
  func.func @_adj_bmm_kernel(%arg0: i32, %arg1: i32, %arg2: i32, %arg3: memref<1xf32, #tpu.memory_space<smem>>, %arg4: memref<1x128x128xbf16, #tpu.memory_space<vmem>>, %arg5: memref<1x128x128xbf16, #tpu.memory_space<vmem>>, %arg6: memref<1x128xf32, #tpu.memory_space<vmem>>, %arg7: memref<1x128x128xf32, #tpu.memory_space<vmem>>) attributes {dimension_semantics = [#tpu.dimension_semantics<parallel>, #tpu.dimension_semantics<parallel>, #tpu.dimension_semantics<arbitrary>], iteration_bounds = array<i64: 2, 1, 1>, scalar_prefetch = 0 : i64, scratch_operands = 0 : i64, tpu.core_type = #tpu.core_type<tc>, window_params = [{transform_indices = @transform_0, window_bounds = array<i64: 1>}, {transform_indices = @transform_1, window_bounds = array<i64: 1, 128, 128>}, {transform_indices = @transform_2, window_bounds = array<i64: 1, 128, 128>}, {pipeline_mode = #tpu.pipeline_mode<synchronous>, transform_indices = @transform_3, window_bounds = array<i64: 1, 128>}, {transform_indices = @transform_4, window_bounds = array<i64: 1, 128, 128>}]} {
    %c0 = arith.constant 0 : index
    %c0_0 = arith.constant 0 : index
    %c0_1 = arith.constant 0 : index
    %0 = vector.load %arg5[%c0, %c0_0, %c0_1] : memref<1x128x128xbf16, #tpu.memory_space<vmem>>, vector<1x128x128xbf16>
    %1 = vector.shape_cast %0 : vector<1x128x128xbf16> to vector<128x128xbf16>
    %c0_2 = arith.constant 0 : index
    %c0_3 = arith.constant 0 : index
    %c0_4 = arith.constant 0 : index
    %2 = vector.load %arg4[%c0_2, %c0_3, %c0_4] : memref<1x128x128xbf16, #tpu.memory_space<vmem>>, vector<1x128x128xbf16>
    %3 = vector.shape_cast %2 : vector<1x128x128xbf16> to vector<128x128xbf16>
    %cst = arith.constant dense<0.000000e+00> : vector<128x128xf32>
    %4 = tpu.matmul %3, %1, %cst {dimension_numbers = #tpu.dot_dimension_numbers<[1], [0], [0], [1], [0, 0, 1, 1], [], []>} : vector<128x128xbf16>, vector<128x128xbf16>, vector<128x128xf32> -> vector<128x128xf32>
    %c0_i32 = arith.constant 0 : i32
    %5 = arith.cmpi eq, %arg2, %c0_i32 : i32
    %6 = arith.extui %5 : i1 to i32
    %c0_i32_5 = arith.constant 0 : i32
    %7 = arith.cmpi ne, %6, %c0_i32_5 : i32
    scf.if %7 {
      %c0_10 = arith.constant 0 : index
      %c0_11 = arith.constant 0 : index
      %c0_12 = arith.constant 0 : index
      %14 = vector.load %arg7[%c0_10, %c0_11, %c0_12] : memref<1x128x128xf32, #tpu.memory_space<vmem>>, vector<1x128x128xf32>
      %15 = vector.shape_cast %14 : vector<1x128x128xf32> to vector<128x128xf32>
      %16 = vector.shape_cast %4 : vector<128x128xf32> to vector<1x128x128xf32>
      tpu.vector_store %arg7[%c0_10, %c0_11, %c0_12], %16 {strides = array<i32>} : memref<1x128x128xf32, #tpu.memory_space<vmem>>, vector<1x128x128xf32>,
    } else {
    }
    %c0_i32_6 = arith.constant 0 : i32
    %8 = arith.cmpi sgt, %arg2, %c0_i32_6 : i32
    %9 = arith.extui %8 : i1 to i32
    %c0_i32_7 = arith.constant 0 : i32
    %10 = arith.cmpi ne, %9, %c0_i32_7 : i32
    scf.if %10 {
      %c0_10 = arith.constant 0 : index
      %c0_11 = arith.constant 0 : index
      %c0_12 = arith.constant 0 : index
      %14 = vector.load %arg7[%c0_10, %c0_11, %c0_12] : memref<1x128x128xf32, #tpu.memory_space<vmem>>, vector<1x128x128xf32>
      %15 = vector.shape_cast %14 : vector<1x128x128xf32> to vector<128x128xf32>
      %16 = arith.addf %15, %4 : vector<128x128xf32>
      %c0_13 = arith.constant 0 : index
      %c0_14 = arith.constant 0 : index
      %c0_15 = arith.constant 0 : index
      %17 = vector.load %arg7[%c0_13, %c0_14, %c0_15] : memref<1x128x128xf32, #tpu.memory_space<vmem>>, vector<1x128x128xf32>
      %18 = vector.shape_cast %17 : vector<1x128x128xf32> to vector<128x128xf32>
      %19 = vector.shape_cast %16 : vector<128x128xf32> to vector<1x128x128xf32>
      tpu.vector_store %arg7[%c0_13, %c0_14, %c0_15], %19 {strides = array<i32>} : memref<1x128x128xf32, #tpu.memory_space<vmem>>, vector<1x128x128xf32>,
    } else {
    }
    %c0_i32_8 = arith.constant 0 : i32
    %11 = arith.cmpi eq, %arg2, %c0_i32_8 : i32
    %12 = arith.extui %11 : i1 to i32
    %c0_i32_9 = arith.constant 0 : i32
    %13 = arith.cmpi ne, %12, %c0_i32_9 : i32
    scf.if %13 {
      %c0_10 = arith.constant 0 : index
      %c0_11 = arith.constant 0 : index
      %c0_12 = arith.constant 0 : index
      %14 = vector.load %arg7[%c0_10, %c0_11, %c0_12] : memref<1x128x128xf32, #tpu.memory_space<vmem>>, vector<1x128x128xf32>
      %15 = vector.shape_cast %14 : vector<1x128x128xf32> to vector<128x128xf32>
      %c0_13 = arith.constant 0 : index
      %c0_14 = arith.constant 0 : index
      %16 = vector.load %arg6[%c0_13, %c0_14] : memref<1x128xf32, #tpu.memory_space<vmem>>, vector<1x128xf32>
      %17 = vector.broadcast %16 : vector<1x128xf32> to vector<128x128xf32>
      %18 = arith.addf %15, %17 : vector<128x128xf32>
      %c0_15 = arith.constant 0 : index
      %19 = memref.load %arg3[%c0_15] : memref<1xf32, #tpu.memory_space<smem>>
      %cst_16 = arith.constant 0.000000e+00 : f32
      %20 = vector.broadcast %cst_16 : f32 to vector<128x128xf32>
      %21 = arith.cmpf ogt, %18, %20 : vector<128x128xf32>
      %22 = vector.broadcast %19 : f32 to vector<128x128xf32>
      %23 = arith.mulf %22, %18 : vector<128x128xf32>
      %24 = arith.select %21, %18, %23 : vector<128x128xi1>, vector<128x128xf32>
      %c0_17 = arith.constant 0 : index
      %c0_18 = arith.constant 0 : index
      %c0_19 = arith.constant 0 : index
      %25 = vector.load %arg7[%c0_17, %c0_18, %c0_19] : memref<1x128x128xf32, #tpu.memory_space<vmem>>, vector<1x128x128xf32>
      %26 = vector.shape_cast %25 : vector<1x128x128xf32> to vector<128x128xf32>
      %27 = vector.shape_cast %24 : vector<128x128xf32> to vector<1x128x128xf32>
      tpu.vector_store %arg7[%c0_17, %c0_18, %c0_19], %27 {strides = array<i32>} : memref<1x128x128xf32, #tpu.memory_space<vmem>>, vector<1x128x128xf32>,
    } else {
    }
    return
  }
  func.func @transform_0(%arg0: i32, %arg1: i32, %arg2: i32) -> i32 {
    %c0_i32 = arith.constant 0 : i32
    %c0_i32_0 = arith.constant 0 : i32
    return %c0_i32 : i32
  }
  func.func @transform_1(%arg0: i32, %arg1: i32, %arg2: i32) -> (i32, i32, i32) {
    %c0_i32 = arith.constant 0 : i32
    return %arg0, %arg1, %arg2 : i32, i32, i32
  }
  func.func @transform_2(%arg0: i32, %arg1: i32, %arg2: i32) -> (i32, i32, i32) {
    %c0_i32 = arith.constant 0 : i32
    %c0_i32_0 = arith.constant 0 : i32
    %c0_i32_1 = arith.constant 0 : i32
    return %arg0, %c0_i32, %c0_i32_0 : i32, i32, i32
  }
  func.func @transform_3(%arg0: i32, %arg1: i32, %arg2: i32) -> (i32, i32) {
    %c0_i32 = arith.constant 0 : i32
    %c0_i32_0 = arith.constant 0 : i32
    %c0_i32_1 = arith.constant 0 : i32
    return %c0_i32, %c0_i32_0 : i32, i32
  }
  func.func @transform_4(%arg0: i32, %arg1: i32, %arg2: i32) -> (i32, i32, i32) {
    %c0_i32 = arith.constant 0 : i32
    %c0_i32_0 = arith.constant 0 : i32
    return %arg0, %arg1, %c0_i32 : i32, i32, i32
  }
}

module attributes {stable_mosaic.version = 11 : i64} {
  func.func @_linear_kernel(%arg0: i32, %arg1: memref<256x128xf32, #tpu.memory_space<vmem>>, %arg2: memref<128x128xbf16, #tpu.memory_space<vmem>>, %arg3: memref<256x128xbf16, #tpu.memory_space<vmem>>) attributes {dimension_semantics = [#tpu.dimension_semantics<parallel>], iteration_bounds = array<i64: 1>, scalar_prefetch = 0 : i64, scratch_operands = 0 : i64, tpu.core_type = #tpu.core_type<tc>, window_params = [{transform_indices = @transform_0, window_bounds = array<i64: 256, 128>}, {pipeline_mode = #tpu.pipeline_mode<synchronous>, transform_indices = @transform_1, window_bounds = array<i64: 128, 128>}, {transform_indices = @transform_2, window_bounds = array<i64: 256, 128>}]} {
    %c0 = arith.constant 0 : index
    %c0_0 = arith.constant 0 : index
    %0 = vector.load %arg1[%c0, %c0_0] : memref<256x128xf32, #tpu.memory_space<vmem>>, vector<256x128xf32>
    %1 = arith.truncf %0 : vector<256x128xf32> to vector<256x128xbf16>
    %c0_1 = arith.constant 0 : index
    %c0_2 = arith.constant 0 : index
    %2 = vector.load %arg2[%c0_1, %c0_2] : memref<128x128xbf16, #tpu.memory_space<vmem>>, vector<128x128xbf16>
    %cst = arith.constant dense<0.000000e+00> : vector<256x128xf32>
    %3 = tpu.matmul %1, %2, %cst {dimension_numbers = #tpu.dot_dimension_numbers<[1], [0], [0], [1], [0, 0, 1, 1], [], []>} : vector<256x128xbf16>, vector<128x128xbf16>, vector<256x128xf32> -> vector<256x128xf32>
    %4 = arith.truncf %3 : vector<256x128xf32> to vector<256x128xbf16>
    %c0_3 = arith.constant 0 : index
    %c0_4 = arith.constant 0 : index
    %5 = vector.load %arg3[%c0_3, %c0_4] : memref<256x128xbf16, #tpu.memory_space<vmem>>, vector<256x128xbf16>
    tpu.vector_store %arg3[%c0_3, %c0_4], %4 {strides = array<i32>} : memref<256x128xbf16, #tpu.memory_space<vmem>>, vector<256x128xbf16>,
    return
  }
  func.func @transform_0(%arg0: i32) -> (i32, i32) {
    %c0_i32 = arith.constant 0 : i32
    %c0_i32_0 = arith.constant 0 : i32
    return %arg0, %c0_i32 : i32, i32
  }
  func.func @transform_1(%arg0: i32) -> (i32, i32) {
    %c0_i32 = arith.constant 0 : i32
    %c0_i32_0 = arith.constant 0 : i32
    %c0_i32_1 = arith.constant 0 : i32
    return %c0_i32, %c0_i32_0 : i32, i32
  }
  func.func @transform_2(%arg0: i32) -> (i32, i32) {
    %c0_i32 = arith.constant 0 : i32
    %c0_i32_0 = arith.constant 0 : i32
    return %arg0, %c0_i32 : i32, i32
  }
}

</mosaic_0001>

<bundles_post_ra>
// kernel: _forward.2
= control target key start
LH: loop header
LB: loop body
LE: loop exit
PB: predicated region body
PF: predicated region fallthrough
CT: control target
= control target key end

     0   :  { %s895_s1 = inlined_call_operand.vmem [shape: bf16[128,128], index: 1, kind: input, shape index: {}]   ;;  %s896_s0 = inlined_call_operand.vmem [shape: f32[256,128], index: 0, kind: input, shape index: {}]   ;;  %s897_s2 = inlined_call_operand.vmem [shape: bf16[256,128], index: 2, kind: output, shape index: {}]  }
   0x1   :  { %v704_v0 = vld [vmem:[%s895_s1 + $0x38] sm:$0xff]   ;;  %v705_v1 = vld [vmem:[%s895_s1 + $0x30] sm:$0xff]   ;;  %v706_v2 = vld [vmem:[%s895_s1 + $0x28] sm:$0xff]  }
   0x2   :  { %640 = vmatprep.subr.bf16.mxu0 %v704_v0  ;;  %688 = vmatprep.subr.bf16.mxu1 %v704_v0  ;;  %v707_v3 = vld [vmem:[%s895_s1 + $0x20] sm:$0xff]   ;;  %v13_v5 = vld [vmem:[%s896_s0 + $0x8] sm:$0xff]  ;;  %v708_v10 = vld [vmem:[%s895_s1 + $0x18] sm:$0xff]  }
   0x3   :  { %641 = vmatpush3.bf16.msra.mxu0 %v704_v0  ;;  %696 = vmatpush3.bf16.msra.mxu1 %v704_v0  ;;  %v12_v4 = vld [vmem:[%s896_s0] sm:$0xff]  ;;  %v29_v8 = vld [vmem:[%s896_s0 + $0x88] sm:$0xff]  ;;  %v709_v11 = vld [vmem:[%s895_s1 + $0x10] sm:$0xff]  }
   0x4   :  { %642 = vmatprep.subr.bf16.mxu0 %v705_v1  ;;  %689 = vmatprep.subr.bf16.mxu1 %v705_v1  ;;  %v28_v6 = vld [vmem:[%s896_s0 + $0x80] sm:$0xff]  ;;  %v44_v7 = vpack.c.bf16 %v13_v5, %v12_v4  ;;  %v710_v12 = vld [vmem:[%s895_s1 + $0x8] sm:$0xff]   ;;  %v14_v14 = vld [vmem:[%s896_s0 + $0x10] sm:$0xff] }
   0x5   :  { %v52_v9 = vpack.c.bf16 %v29_v8, %v28_v6  ;;  %v711_v13 = vld [vmem:[%s895_s1] sm:$0xff]   ;;  %v15_v15 = vld [vmem:[%s896_s0 + $0x18] sm:$0xff]  ;;  %v30_v16 = vld [vmem:[%s896_s0 + $0x90] sm:$0xff] }
   0x6   :  { %656 = vmatprep.mubr.bf16.mxu0 %v44_v7  ;;  %v31_v17 = vld [vmem:[%s896_s0 + $0x98] sm:$0xff]  ;;  %v16_v18 = vld [vmem:[%s896_s0 + $0x20] sm:$0xff]  ;;  %v17_v19 = vld [vmem:[%s896_s0 + $0x28] sm:$0xff]  ;;  %v45_v22 = vpack.c.bf16 %v15_v15, %v14_v14 }
   0x7   :  { %643 = vmatpush3.bf16.msra.mxu0 %v705_v1  ;;  %697 = vmatpush3.bf16.msra.mxu1 %v705_v1  ;;  %v32_v20 = vld [vmem:[%s896_s0 + $0xa0] sm:$0xff]  ;;  %v33_v21 = vld [vmem:[%s896_s0 + $0xa8] sm:$0xff]  ;;  %v53_v23 = vpack.c.bf16 %v31_v17, %v30_v16  ;;  %v46_v24 = vpack.c.bf16 %v17_v19, %v16_v18  ;;  %v18_v26 = vld [vmem:[%s896_s0 + $0x30] sm:$0xff] }
   0x8   :  { %644 = vmatprep.subr.bf16.mxu0 %v706_v2  ;;  %690 = vmatprep.subr.bf16.mxu1 %v706_v2  ;;  %v54_v25 = vpack.c.bf16 %v33_v21, %v32_v20  ;;  %v19_v27 = vld [vmem:[%s896_s0 + $0x38] sm:$0xff]  ;;  %v34_v28 = vld [vmem:[%s896_s0 + $0xb0] sm:$0xff]  ;;  %v20_v30 = vld [vmem:[%s896_s0 + $0x40] sm:$0xff] }
   0x9   :  { %672 = vmatprep.mubr.bf16.mxu1 %v52_v9  ;;  %v35_v29 = vld [vmem:[%s896_s0 + $0xb8] sm:$0xff]  ;;  %v21_v31 = vld [vmem:[%s896_s0 + $0x48] sm:$0xff]  ;;  %v36_v32 = vld [vmem:[%s896_s0 + $0xc0] sm:$0xff]  ;;  %v47_v34 = vpack.c.bf16 %v19_v27, %v18_v26 }
   0xa   :  { %v37_v33 = vld [vmem:[%s896_s0 + $0xc8] sm:$0xff]  ;;  %v55_v35 = vpack.c.bf16 %v35_v29, %v34_v28  ;;  %v48_v36 = vpack.c.bf16 %v21_v31, %v20_v30  ;;  %v22_v38 = vld [vmem:[%s896_s0 + $0x50] sm:$0xff]  ;;  %v23_v39 = vld [vmem:[%s896_s0 + $0x58] sm:$0xff] }
   0xb   :  { %645 = vmatpush3.bf16.msra.mxu0 %v706_v2  ;;  %698 = vmatpush3.bf16.msra.mxu1 %v706_v2  ;;  %v56_v37 = vpack.c.bf16 %v37_v33, %v36_v32  ;;  %v38_v40 = vld [vmem:[%s896_s0 + $0xd0] sm:$0xff]  ;;  %v39_v41 = vld [vmem:[%s896_s0 + $0xd8] sm:$0xff]  ;;  %v24_v42 = vld [vmem:[%s896_s0 + $0x60] sm:$0xff]  ;;  %v49_v46 = vpack.c.bf16 %v23_v39, %v22_v38 }
   0xc   :  { %646 = vmatprep.subr.bf16.mxu0 %v707_v3  ;;  %691 = vmatprep.subr.bf16.mxu1 %v707_v3  ;;  %v25_v43 = vld [vmem:[%s896_s0 + $0x68] sm:$0xff]  ;;  %v40_v44 = vld [vmem:[%s896_s0 + $0xe0] sm:$0xff]  ;;  %v57_v47 = vpack.c.bf16 %v39_v41, %v38_v40  ;;  %v26_v50 = vld [vmem:[%s896_s0 + $0x70] sm:$0xff] }
   0xd   :  { %v41_v45 = vld [vmem:[%s896_s0 + $0xe8] sm:$0xff]  ;;  %v50_v48 = vpack.c.bf16 %v25_v43, %v24_v42  ;;  %v27_v51 = vld [vmem:[%s896_s0 + $0x78] sm:$0xff]  ;;  %v42_v52 = vld [vmem:[%s896_s0 + $0xf0] sm:$0xff] }
   0xe   :  { %v58_v49 = vpack.c.bf16 %v41_v45, %v40_v44  ;;  %v43_v53 = vld [vmem:[%s896_s0 + $0xf8] sm:$0xff]  ;;  %v51_v54 = vpack.c.bf16 %v27_v51, %v26_v50 }
   0xf   :  { %647 = vmatpush3.bf16.msra.mxu0 %v707_v3  ;;  %699 = vmatpush3.bf16.msra.mxu1 %v707_v3  ;;  %v59_v55 = vpack.c.bf16 %v43_v53, %v42_v52 }
  0x10   :  { %648 = vmatprep.subr.bf16.mxu0 %v708_v10  ;;  %692 = vmatprep.subr.bf16.mxu1 %v708_v10 }
  0x13   :  { %649 = vmatpush3.bf16.msra.mxu0 %v708_v10  ;;  %700 = vmatpush3.bf16.msra.mxu1 %v708_v10 }
  0x14   :  { %650 = vmatprep.subr.bf16.mxu0 %v709_v11  ;;  %693 = vmatprep.subr.bf16.mxu1 %v709_v11 }
  0x17   :  { %651 = vmatpush3.bf16.msra.mxu0 %v709_v11  ;;  %701 = vmatpush3.bf16.msra.mxu1 %v709_v11 }
  0x18   :  { %652 = vmatprep.subr.bf16.mxu0 %v710_v12  ;;  %694 = vmatprep.subr.bf16.mxu1 %v710_v12 }
  0x1b   :  { %653 = vmatpush3.bf16.msra.mxu0 %v710_v12  ;;  %702 = vmatpush3.bf16.msra.mxu1 %v710_v12 }
  0x1c   :  { %654 = vmatprep.subr.bf16.mxu0 %v711_v13  ;;  %695 = vmatprep.subr.bf16.mxu1 %v711_v13 }
  0x1f   :  { %655 = vmatpush3.bf16.msra.mxu0 %v711_v13  ;;  %703 = vmatpush3.bf16.msra.mxu1 %v711_v13 }
  0x22   :  { %657 = vmatmul.mubr.bf16.vlgmr.msra.gmra.mxu0 %v45_v22  ;;  %673 = vmatmul.mubr.bf16.vlgmr.msra.gmra.mxu1 %v53_v23 }
  0x23   :  { %660 = vmatprep.mubr.bf16.mxu0 %v46_v24  ;;  %676 = vmatprep.mubr.bf16.mxu1 %v54_v25 }
  0x2a   :  { %661 = vmatmul.mubr.bf16.gmra.mxu0 %v47_v34  ;;  %677 = vmatmul.mubr.bf16.gmra.mxu1 %v55_v35 }
  0x2b   :  { %664 = vmatprep.mubr.bf16.mxu0 %v48_v36  ;;  %680 = vmatprep.mubr.bf16.mxu1 %v56_v37 }
  0x32   :  { %665 = vmatmul.mubr.bf16.gmra.mxu0 %v49_v46  ;;  %681 = vmatmul.mubr.bf16.gmra.mxu1 %v57_v47 }
  0x33   :  { %668 = vmatprep.mubr.bf16.mxu0 %v50_v48  ;;  %684 = vmatprep.mubr.bf16.mxu1 %v58_v49 }
  0x3a   :  { %669 = vmatmul.mubr.bf16.gmra.mxu0 %v51_v54  ;;  %685 = vmatmul.mubr.bf16.gmra.mxu1 %v59_v55 }
  0xe2   :  { %v658_v56 = vpop.f32.mrf.mxu0  ;;  %v674_v57 = vpop.f32.mrf.mxu1 }
  0xe4   :  { %v158_v58 = vpop.f32.mrf.mxu0  ;;  %v222_v59 = vpop.f32.mrf.mxu1 }
  0xe6   :  { %v659_v60 = vpop.f32.mrf.mxu0  ;;  %v675_v61 = vpop.f32.mrf.mxu1 }
  0xe7   :  { %v529_v62 = vpack.c.bf16 %v659_v60, %v658_v56  ;;  %v569_v63 = vpack.c.bf16 %v675_v61, %v674_v57 }
  0xe8   :  { %v161_v0 = vpop.f32.mrf.mxu0  ;;  %v225_v1 = vpop.f32.mrf.mxu1 }
  0xe9   :  { %601 = vst [vmem:[%s897_s2 + $0x8] sm:$0xff] %v529_v62   ;;  %609 = vst [vmem:[%s897_s2 + $0x48] sm:$0xff] %v569_v63   ;;  %v524_v2 = vpack.c.bf16 %v161_v0, %v158_v58  ;;  %v564_v3 = vpack.c.bf16 %v225_v1, %v222_v59 }
  0xea   :  { %v662_v4 = vpop.f32.mrf.mxu0  ;;  %v678_v5 = vpop.f32.mrf.mxu1 }
  0xeb   :  { %525 = vst [vmem:[%s897_s2] sm:$0xff] %v524_v2   ;;  %608 = vst [vmem:[%s897_s2 + $0x40] sm:$0xff] %v564_v3  }
  0xec   :  { %v174_v6 = vpop.f32.mrf.mxu0  ;;  %v238_v7 = vpop.f32.mrf.mxu1 }
  0xee   :  { %v663_v8 = vpop.f32.mrf.mxu0  ;;  %v679_v9 = vpop.f32.mrf.mxu1 }
  0xef   :  { %v539_v10 = vpack.c.bf16 %v663_v8, %v662_v4  ;;  %v579_v11 = vpack.c.bf16 %v679_v9, %v678_v5 }
  0xf0   :  { %v177_v12 = vpop.f32.mrf.mxu0  ;;  %v241_v13 = vpop.f32.mrf.mxu1 }
  0xf1   :  { %603 = vst [vmem:[%s897_s2 + $0x18] sm:$0xff] %v539_v10   ;;  %611 = vst [vmem:[%s897_s2 + $0x58] sm:$0xff] %v579_v11   ;;  %v534_v14 = vpack.c.bf16 %v177_v12, %v174_v6  ;;  %v574_v15 = vpack.c.bf16 %v241_v13, %v238_v7 }
  0xf2   :  { %v666_v16 = vpop.f32.mrf.mxu0  ;;  %v682_v17 = vpop.f32.mrf.mxu1 }
  0xf3   :  { %602 = vst [vmem:[%s897_s2 + $0x10] sm:$0xff] %v534_v14   ;;  %610 = vst [vmem:[%s897_s2 + $0x50] sm:$0xff] %v574_v15  }
  0xf4   :  { %v190_v18 = vpop.f32.mrf.mxu0  ;;  %v254_v19 = vpop.f32.mrf.mxu1 }
  0xf6   :  { %v667_v20 = vpop.f32.mrf.mxu0  ;;  %v683_v21 = vpop.f32.mrf.mxu1 }
  0xf7   :  { %v549_v22 = vpack.c.bf16 %v667_v20, %v666_v16  ;;  %v589_v23 = vpack.c.bf16 %v683_v21, %v682_v17 }
  0xf8   :  { %v193_v24 = vpop.f32.mrf.mxu0  ;;  %v257_v25 = vpop.f32.mrf.mxu1 }
  0xf9   :  { %605 = vst [vmem:[%s897_s2 + $0x28] sm:$0xff] %v549_v22   ;;  %613 = vst [vmem:[%s897_s2 + $0x68] sm:$0xff] %v589_v23   ;;  %v544_v26 = vpack.c.bf16 %v193_v24, %v190_v18  ;;  %v584_v27 = vpack.c.bf16 %v257_v25, %v254_v19 }
  0xfa   :  { %v670_v28 = vpop.f32.mrf.mxu0  ;;  %v686_v29 = vpop.f32.mrf.mxu1 }
  0xfb   :  { %604 = vst [vmem:[%s897_s2 + $0x20] sm:$0xff] %v544_v26   ;;  %612 = vst [vmem:[%s897_s2 + $0x60] sm:$0xff] %v584_v27  }
  0xfc   :  { %v206_v30 = vpop.f32.mrf.mxu0  ;;  %v270_v31 = vpop.f32.mrf.mxu1 }
  0xfe   :  { %v671_v32 = vpop.f32.mrf.mxu0  ;;  %v687_v33 = vpop.f32.mrf.mxu1 }
  0xff   :  { %v559_v34 = vpack.c.bf16 %v671_v32, %v670_v28  ;;  %v599_v35 = vpack.c.bf16 %v687_v33, %v686_v29 }
 0x100   :  { %v209_v36 = vpop.f32.mrf.mxu0  ;;  %v273_v37 = vpop.f32.mrf.mxu1 }
 0x101   :  { %607 = vst [vmem:[%s897_s2 + $0x38] sm:$0xff] %v559_v34   ;;  %615 = vst [vmem:[%s897_s2 + $0x78] sm:$0xff] %v599_v35   ;;  %v554_v38 = vpack.c.bf16 %v209_v36, %v206_v30  ;;  %v594_v39 = vpack.c.bf16 %v273_v37, %v270_v31 }
 0x103   :  { %606 = vst [vmem:[%s897_s2 + $0x30] sm:$0xff] %v554_v38   ;;  %614 = vst [vmem:[%s897_s2 + $0x70] sm:$0xff] %v594_v39  }

// kernel: _forward.3
= control target key start
LH: loop header
LB: loop body
LE: loop exit
PB: predicated region body
PF: predicated region fallthrough
CT: control target
= control target key end

     0   :  { %s976_s17 = smov 0   ;;  %s978_s18 = smov 0   ;;  %s1093_s0 = inlined_call_operand.<no memory space> [shape: f32[1], index: 0, kind: input, shape index: {}]   ;;  %s1094_s1 = inlined_call_operand.vmem [shape: bf16[2,128,128], index: 1, kind: input, shape index: {}]   ;;  %s1095_s2 = inlined_call_operand.vmem [shape: bf16[2,128,128], index: 2, kind: input, shape index: {}]   ;;  %s1096_s3 = inlined_call_operand.vmem [shape: f32[1,128], index: 3, kind: input, shape index: {}]   ;;  %s1097_s4 = inlined_call_operand.vmem [shape: f32[2,128,128], index: 4, kind: output, shape index: {}]  }
   0x1   :  { %9 = sst [smem:[#allocation2]] %s1093_s0  ;;  %s980_s19 = smov 0  }
   0x2 LB: > { %s34_s0 = sadd.s32 1, %s942_s18  ;;  %p791_p0 = scmp.ge.s32.totalorder %s946_s19, 1  ;;  %s946_s19 = sphi %s980_s19, %s15_s19   ;;  %s942_s18 = sphi %s978_s18, %s1099_s18   ;;  %s938_s17 = sphi %s976_s17, %s1098_s17  }
   0x3   : > { %p36_p1 = scmp.ge.s32.totalorder %s34_s0, 2  ;;  %p206_p2 = scmp.lt.s32.totalorder %s946_s19, 3 }
   0x5   : > { %s1101_s0 = smov (%p36_p1, %s34_s0), 0  ;;  %p207_p3 = pnand %p791_p0, %p206_p2 }
   0x6   : > { %p249_p4 = scmp.lt.s32.totalorder (!%p207_p3), %s938_s17, 1  ;;  %s616_s27 = sld [smem:[#allocation2]] (!%p207_p3) }
   0x7   : > { %210 = sbr.rel (%p207_p3) target bundleno = 263 (0x107), region = 36 }
   0xc   : > { %s1103_s17 = smov (!%p249_p4, %s938_s17), 1  ;;  %v1026_v16 = vld [vmem:[%s1096_s3] ss:$0 sm:$0xff]  ;;  %v1029_v18 = vstv %s616_s27 }
   0xd   : > { %s817_s20 = sshll.u32 %s1103_s17, 6  ;;  %s819_s30 = sshll.u32 %s1103_s17, 7 }
   0xe   : > { %s1000_s23 = scalar_lea.vmem %s1095_s2, %s817_s20  ;;  %s1008_s26 = scalar_lea.vmem %s1094_s1, %s817_s20 }
   0xf   : > { %v908_v0 = vld [vmem:[%s1000_s23 + $0x38] sm:$0xff]   ;;  %v909_v1 = vld [vmem:[%s1000_s23 + $0x30] sm:$0xff]   ;;  %v910_v2 = vld [vmem:[%s1000_s23 + $0x28] sm:$0xff]   ;;  %s1036_s7 = scalar_lea.vmem %s1097_s4, %s819_s30 }
  0x10   : > { %836 = vmatprep.subr.bf16.mxu0 %v908_v0  ;;  %868 = vmatprep.subr.bf16.mxu1 %v908_v0  ;;  %v911_v3 = vld [vmem:[%s1000_s23 + $0x20] sm:$0xff]   ;;  %v912_v6 = vld [vmem:[%s1000_s23 + $0x18] sm:$0xff]   ;;  %v913_v7 = vld [vmem:[%s1000_s23 + $0x10] sm:$0xff]  }
  0x11   : > { %837 = vmatpush3.bf16.msra.mxu0 %v908_v0  ;;  %876 = vmatpush3.bf16.msra.mxu1 %v908_v0  ;;  %v916_v4 = vld [vmem:[%s1008_s26] sm:$0xff]   ;;  %v914_v8 = vld [vmem:[%s1000_s23 + $0x8] sm:$0xff]   ;;  %v920_v12 = vld [vmem:[%s1008_s26 + $0x10] sm:$0xff]  }
  0x12   : > { %838 = vmatprep.subr.bf16.mxu0 %v909_v1  ;;  %869 = vmatprep.subr.bf16.mxu1 %v909_v1  ;;  %v917_v5 = vld [vmem:[%s1008_s26 + $0x20] sm:$0xff]   ;;  %v918_v10 = vld [vmem:[%s1008_s26 + $0x8] sm:$0xff]   ;;  %v921_v13 = vld [vmem:[%s1008_s26 + $0x30] sm:$0xff]  }
  0x13   : > { %852 = vmatprep.mubr.bf16.mxu0 %v916_v4  ;;  %860 = vmatprep.mubr.bf16.mxu1 %v917_v5  ;;  %v915_v9 = vld [vmem:[%s1000_s23] sm:$0xff]   ;;  %v919_v11 = vld [vmem:[%s1008_s26 + $0x28] sm:$0xff]   ;;  %v922_v14 = vld [vmem:[%s1008_s26 + $0x18] sm:$0xff]  }
  0x14   : > { %v923_v15 = vld [vmem:[%s1008_s26 + $0x38] sm:$0xff]  }
  0x15   : > { %839 = vmatpush3.bf16.msra.mxu0 %v909_v1  ;;  %877 = vmatpush3.bf16.msra.mxu1 %v909_v1 }
  0x16   : > { %840 = vmatprep.subr.bf16.mxu0 %v910_v2  ;;  %870 = vmatprep.subr.bf16.mxu1 %v910_v2 }
  0x19   : > { %841 = vmatpush3.bf16.msra.mxu0 %v910_v2  ;;  %878 = vmatpush3.bf16.msra.mxu1 %v910_v2 }
  0x1a   : > { %842 = vmatprep.subr.bf16.mxu0 %v911_v3  ;;  %871 = vmatprep.subr.bf16.mxu1 %v911_v3 }
  0x1d   : > { %843 = vmatpush3.bf16.msra.mxu0 %v911_v3  ;;  %879 = vmatpush3.bf16.msra.mxu1 %v911_v3 }
  0x1e   : > { %844 = vmatprep.subr.bf16.mxu0 %v912_v6  ;;  %872 = vmatprep.subr.bf16.mxu1 %v912_v6 }
  0x21   : > { %845 = vmatpush3.bf16.msra.mxu0 %v912_v6  ;;  %880 = vmatpush3.bf16.msra.mxu1 %v912_v6 }
  0x22   : > { %846 = vmatprep.subr.bf16.mxu0 %v913_v7  ;;  %873 = vmatprep.subr.bf16.mxu1 %v913_v7 }
  0x25   : > { %847 = vmatpush3.bf16.msra.mxu0 %v913_v7  ;;  %881 = vmatpush3.bf16.msra.mxu1 %v913_v7 }
  0x26   : > { %848 = vmatprep.subr.bf16.mxu0 %v914_v8  ;;  %874 = vmatprep.subr.bf16.mxu1 %v914_v8 }
  0x29   : > { %849 = vmatpush3.bf16.msra.mxu0 %v914_v8  ;;  %882 = vmatpush3.bf16.msra.mxu1 %v914_v8 }
  0x2a   : > { %850 = vmatprep.subr.bf16.mxu0 %v915_v9  ;;  %875 = vmatprep.subr.bf16.mxu1 %v915_v9 }
  0x2d   : > { %851 = vmatpush3.bf16.msra.mxu0 %v915_v9  ;;  %883 = vmatpush3.bf16.msra.mxu1 %v915_v9 }
  0x30   : > { %853 = vmatmul.mubr.bf16.vlgmr.msra.gmra.mxu0 %v918_v10  ;;  %861 = vmatmul.mubr.bf16.vlgmr.msra.gmra.mxu1 %v919_v11 }
  0x31   : > { %856 = vmatprep.mubr.bf16.mxu0 %v920_v12  ;;  %864 = vmatprep.mubr.bf16.mxu1 %v921_v13 }
  0x38   : > { %857 = vmatmul.mubr.bf16.gmra.mxu0 %v922_v14  ;;  %865 = vmatmul.mubr.bf16.gmra.mxu1 %v923_v15 }
  0xf0   : > { %v854_v17 = vpop.f32.mrf.mxu0  ;;  %v862_v19 = vpop.f32.mrf.mxu1 }
  0xf1   : > { %v602_v20 = vadd.f32 %v854_v17, %v1026_v16  ;;  %v610_v21 = vadd.f32 %v862_v19, %v1026_v16 }
  0xf2   : > { %v439_v22 = vpop.f32.mrf.mxu0  ;;  %v471_v23 = vpop.f32.mrf.mxu1 }
  0xf3   : > { %vm619_vm0 = vcmp.gt.f32.partialorder %v602_v20, 0.0  ;;  %v636_v24 = vmul.f32 %v1029_v18, %v602_v20  ;;  %vm627_vm1 = vcmp.gt.f32.partialorder %v610_v21, 0.0  ;;  %v644_v25 = vmul.f32 %v1029_v18, %v610_v21 }
  0xf4   : > { %v600_v26 = vadd.f32 %v1026_v16, %v439_v22  ;;  %v608_v27 = vadd.f32 %v1026_v16, %v471_v23  ;;  %v855_v28 = vpop.f32.mrf.mxu0  ;;  %v863_v29 = vpop.f32.mrf.mxu1 }
  0xf5   : > { %v652_v30 = vsel %vm619_vm0, %v602_v20, %v636_v24  ;;  %v660_v31 = vsel %vm627_vm1, %v610_v21, %v644_v25  ;;  %v603_v32 = vadd.f32 %v855_v28, %v1026_v16  ;;  %v611_v33 = vadd.f32 %v863_v29, %v1026_v16 }
  0xf6   : > { %668 = vst [vmem:[%s1036_s7 + $0x10] sm:$0xff] %v652_v30  ;;  %676 = vst [vmem:[%s1036_s7 + $0x50] sm:$0xff] %v660_v31  ;;  %vm617_vm2 = vcmp.gt.f32.partialorder %v600_v26, 0.0  ;;  %v634_v34 = vmul.f32 %v1029_v18, %v600_v26  ;;  %vm625_vm3 = vcmp.gt.f32.partialorder %v608_v27, 0.0  ;;  %v642_v35 = vmul.f32 %v1029_v18, %v608_v27  ;;  %v442_v36 = vpop.f32.mrf.mxu0  ;;  %v474_v37 = vpop.f32.mrf.mxu1 }
  0xf7   : > { %vm620_vm4 = vcmp.gt.f32.partialorder %v603_v32, 0.0  ;;  %v637_v38 = vmul.f32 %v1029_v18, %v603_v32  ;;  %vm628_vm5 = vcmp.gt.f32.partialorder %v611_v33, 0.0  ;;  %v645_v39 = vmul.f32 %v1029_v18, %v611_v33 }
  0xf8   : > { %v650_v40 = vsel %vm617_vm2, %v600_v26, %v634_v34  ;;  %v658_v41 = vsel %vm625_vm3, %v608_v27, %v642_v35  ;;  %v601_v42 = vadd.f32 %v1026_v16, %v442_v36  ;;  %v609_v43 = vadd.f32 %v1026_v16, %v474_v37  ;;  %v858_v44 = vpop.f32.mrf.mxu0  ;;  %v866_v45 = vpop.f32.mrf.mxu1 }
  0xf9   : > { %666 = vst [vmem:[%s1036_s7] sm:$0xff] %v650_v40  ;;  %674 = vst [vmem:[%s1036_s7 + $0x40] sm:$0xff] %v658_v41  ;;  %v653_v46 = vsel %vm620_vm4, %v603_v32, %v637_v38  ;;  %v661_v47 = vsel %vm628_vm5, %v611_v33, %v645_v39  ;;  %v606_v48 = vadd.f32 %v858_v44, %v1026_v16 }
  0xfa   : > { %v614_v49 = vadd.f32 %v866_v45, %v1026_v16  ;;  %669 = vst [vmem:[%s1036_s7 + $0x18] sm:$0xff] %v653_v46  ;;  %677 = vst [vmem:[%s1036_s7 + $0x58] sm:$0xff] %v661_v47  ;;  %vm618_vm6 = vcmp.gt.f32.partialorder %v601_v42, 0.0  ;;  %v635_v50 = vmul.f32 %v1029_v18, %v601_v42  ;;  %vm626_vm7 = vcmp.gt.f32.partialorder %v609_v43, 0.0  ;;  %v455_v52 = vpop.f32.mrf.mxu0  ;;  %v487_v53 = vpop.f32.mrf.mxu1 }
  0xfb   : > { %v643_v51 = vmul.f32 %v1029_v18, %v609_v43  ;;  %vm623_vm8 = vcmp.gt.f32.partialorder %v606_v48, 0.0  ;;  %v640_v54 = vmul.f32 %v1029_v18, %v606_v48  ;;  %v604_v58 = vadd.f32 %v1026_v16, %v455_v52 }
  0xfc   : > { %vm631_vm9 = vcmp.gt.f32.partialorder %v614_v49, 0.0  ;;  %v648_v55 = vmul.f32 %v1029_v18, %v614_v49  ;;  %v651_v56 = vsel %vm618_vm6, %v601_v42, %v635_v50  ;;  %v612_v59 = vadd.f32 %v1026_v16, %v487_v53  ;;  %v859_v60 = vpop.f32.mrf.mxu0  ;;  %v867_v61 = vpop.f32.mrf.mxu1 }
  0xfd   : > { %v659_v57 = vsel %vm626_vm7, %v609_v43, %v643_v51  ;;  %667 = vst [vmem:[%s1036_s7 + $0x8] sm:$0xff] %v651_v56  ;;  %v656_v62 = vsel %vm623_vm8, %v606_v48, %v640_v54  ;;  %v607_v0 = vadd.f32 %v859_v60, %v1026_v16  ;;  %v615_v1 = vadd.f32 %v867_v61, %v1026_v16 }
  0xfe   : > { %675 = vst [vmem:[%s1036_s7 + $0x48] sm:$0xff] %v659_v57  ;;  %v664_v63 = vsel %vm631_vm9, %v614_v49, %v648_v55  ;;  %672 = vst [vmem:[%s1036_s7 + $0x30] sm:$0xff] %v656_v62  ;;  %vm621_vm10 = vcmp.gt.f32.partialorder %v604_v58, 0.0  ;;  %v638_v2 = vmul.f32 %v1029_v18, %v604_v58  ;;  %vm629_vm11 = vcmp.gt.f32.partialorder %v612_v59, 0.0  ;;  %v458_v4 = vpop.f32.mrf.mxu0  ;;  %v490_v5 = vpop.f32.mrf.mxu1 }
  0xff   : > { %680 = vst [vmem:[%s1036_s7 + $0x70] sm:$0xff] %v664_v63  ;;  %v646_v3 = vmul.f32 %v1029_v18, %v612_v59  ;;  %vm624_vm12 = vcmp.gt.f32.partialorder %v607_v0, 0.0  ;;  %v641_v6 = vmul.f32 %v1029_v18, %v607_v0  ;;  %vm632_vm13 = vcmp.gt.f32.partialorder %v615_v1, 0.0 }
 0x100   : > { %v649_v7 = vmul.f32 %v1029_v18, %v615_v1  ;;  %v654_v8 = vsel %vm621_vm10, %v604_v58, %v638_v2  ;;  %v605_v10 = vadd.f32 %v1026_v16, %v458_v4  ;;  %v613_v11 = vadd.f32 %v1026_v16, %v490_v5 }
 0x101   : > { %v662_v9 = vsel %vm629_vm11, %v612_v59, %v646_v3  ;;  %670 = vst [vmem:[%s1036_s7 + $0x20] sm:$0xff] %v654_v8  ;;  %v657_v12 = vsel %vm624_vm12, %v607_v0, %v641_v6 }
 0x102   : > { %678 = vst [vmem:[%s1036_s7 + $0x60] sm:$0xff] %v662_v9  ;;  %v665_v13 = vsel %vm632_vm13, %v615_v1, %v649_v7  ;;  %673 = vst [vmem:[%s1036_s7 + $0x38] sm:$0xff] %v657_v12  ;;  %vm622_vm14 = vcmp.gt.f32.partialorder %v605_v10, 0.0  ;;  %v639_v14 = vmul.f32 %v1029_v18, %v605_v10  ;;  %vm630_vm15 = vcmp.gt.f32.partialorder %v613_v11, 0.0 }
 0x103   : > { %681 = vst [vmem:[%s1036_s7 + $0x78] sm:$0xff] %v665_v13  ;;  %v647_v15 = vmul.f32 %v1029_v18, %v613_v11 }
 0x104   : > { %v655_v17 = vsel %vm622_vm14, %v605_v10, %v639_v14 }
 0x105   : > { %v663_v19 = vsel %vm630_vm15, %v613_v11, %v647_v15  ;;  %671 = vst [vmem:[%s1036_s7 + $0x28] sm:$0xff] %v655_v17 }
 0x106   : > { %679 = vst [vmem:[%s1036_s7 + $0x68] sm:$0xff] %v663_v19 }
 0x107 PF: > { %s15_s19 = sadd.s32 1, %s946_s19   ;;  %s1098_s17 = smov %s942_s18 }
 0x108   : > { %p12_p5 = scmp.ge.s32.totalorder %s15_s19, 4   ;;  %s1099_s18 = smov %s1101_s0 }
 0x10a   :  { %14 = sbr.rel (!%p12_p5) target bundleno = 2 (0x2), region = 81 }

</bundles_post_ra>
